<compile_context>
chip_gen: v7x
topology: tpu7x:2x2x1
jax: 0.10.0
libtpu: 0.0.40
codegen_flags: <defaults>
</compile_context>

<pallas_src>
import functools

import jax
import jax.numpy as jnp
from jax.experimental import pallas as pl
from jax.experimental.pallas import tpu as pltpu


def _round_up(x, m):
    return (x + m - 1) // m * m


def fan_kernel(x_ref, wab_ref, bab_ref, wct_ref, wcb_ref, bc_ref, o_ref,
               *, hp, bf16_gate):
    # In-kernel bf16 cast of the streamed f32 activation block (VPU, hidden
    # under the MXU pass).
    x = x_ref[...].astype(jnp.bfloat16)                           # (TB, D)

    # Fused attn + W_s matmul: one MXU pass (TB, D) @ (D, 2*Hp) -> f32.
    y = jnp.dot(x, wab_ref[...], preferred_element_type=jnp.float32) + bab_ref[...]
    a = y[:, :hp]          # attn logits; padded cols have -1e30 bias -> softmax 0
    s = y[:, hp:]          # W_s pre-activation; padded cols are exactly 0

    # Softmax over the feature axis (dim=1 in the PyTorch module).
    # max / exp / sum kept in f32 so the -1e30 padded columns underflow to 0.
    a_max = jnp.max(a, axis=-1, keepdims=True)
    a_exp = jnp.exp(a - a_max)                                    # f32
    inv_denom = pl.reciprocal(jnp.sum(a_exp, axis=-1, keepdims=True),
                              approx=True)                        # EUP vrcp

    if bf16_gate:
        # v6e/v7x: packed-bf16 VALU for relu + gate (2x elementwise throughput,
        # half the vreg/VMEM pressure on the (TB, Hp) intermediates).
        q_s = jnp.maximum(s, 0.0).astype(jnp.bfloat16)            # (TB, Hp)
        attn_weights = (a_exp * inv_denom).astype(jnp.bfloat16)
        attn_applied = attn_weights * q_s                         # bf16
    else:
        # v5e (no bf16 VALU): keep elementwise in f32, cast only the MXU operands.
        q_s_f32 = jnp.maximum(s, 0.0)
        attn_applied = ((a_exp * inv_denom) * q_s_f32).astype(jnp.bfloat16)
        q_s = q_s_f32.astype(jnp.bfloat16)

    # Linear(6D -> C) on cat([q_s, attn_applied], 1), split into two matmuls
    # against the row-split (and zero-padded) combine weight.
    out = (jnp.dot(q_s, wct_ref[...], preferred_element_type=jnp.float32)
           + jnp.dot(attn_applied, wcb_ref[...], preferred_element_type=jnp.float32)
           + bc_ref[...])
    o_ref[...] = out.astype(o_ref.dtype)                          # (TB, Cp) bf16, lane-dense


def _vmem_limit_bytes():
    """Generation-aware VMEM request: ~75% of physical, capped at 100 MiB."""
    try:
        cap = int(pltpu.get_tpu_info().vmem_capacity_bytes)
    except Exception:
        cap = 128 * 1024 * 1024
    return min(cap * 3 // 4, 100 * 1024 * 1024)


def _vmem_row_cap(d, hp, cp, vmem_limit):
    """Max batch-tile rows that fit VMEM alongside the resident weights."""
    weights = d * (2 * hp) * 2 + 2 * hp * cp * 2 + (2 * hp + cp) * 4
    per_row = (2 * d * 4          # double-buffered f32 x block
               + 2 * hp * 4       # fused (tb, 2*Hp) f32 matmul result
               + 4 * hp * 4       # softmax / relu / gate intermediates (f32 worst case)
               + 2 * cp * 2)      # double-buffered bf16 out block
    budget = vmem_limit - weights - (8 << 20)   # headroom for Mosaic scratch
    return max(16, (budget // per_row) // 16 * 16)


def _choose_tb(b, row_cap):
    """Batch tile: multiple of 16, >=2 grid steps when useful, bounded padding."""
    row_cap = max(16, (row_cap // 16) * 16)
    if b <= 16:
        return 16
    if b <= 2 * row_cap and b <= 1024:
        # Medium batch: two tiles so v7x's 2 TensorCores both get work.
        return min(_round_up(pl.cdiv(b, 2), 16), row_cap)
    # Large batch: biggest tile (<=512) that fits VMEM with modest padding waste.
    for tb in (512, 384, 256, 192, 128, 64, 32):
        if tb > row_cap:
            continue
        if _round_up(b, tb) - b <= max(b // 8, tb // 4):
            return tb
    return min(32, row_cap)


def _use_bf16_gate():
    """bf16 elementwise gate only on chips with a bf16 VALU (v6e / v7x)."""
    try:
        kind = jax.devices()[0].device_kind.lower()
    except Exception:
        return True
    return not any(t in kind for t in ("v2", "v3", "v4", "v5"))


def prototypical_net_fan(x, packed):
    """x: (B, D) float32. packed: dict from pack_params(). Returns (B, C) f32."""
    B, D = x.shape
    wab, bab = packed["wab"], packed["bab"]      # (D, 2*Hp) bf16, (1, 2*Hp) f32
    wct, wcb = packed["wct"], packed["wcb"]      # (Hp, Cp) bf16 each
    bc = packed["bc"]                            # (1, Cp) f32
    hp, C = packed["hp"], packed["c"]
    Cp = bc.shape[-1]

    vmem_limit = _vmem_limit_bytes()
    tb = _choose_tb(B, _vmem_row_cap(D, hp, Cp, vmem_limit))
    bp = _round_up(B, tb)

    xp = x if bp == B else jnp.pad(x, ((0, bp - B), (0, 0)))      # f32, cast in-kernel

    kernel = functools.partial(fan_kernel, hp=hp, bf16_gate=_use_bf16_gate())

    def _run(single_buffer_weights):
        if single_buffer_weights:
            # Resident weights: index_map is constant, so a single VMEM buffer
            # suffices — reclaims the double-buffer copy (matters on v7x 64 MiB).
            const = lambda shape: pl.BlockSpec(shape, lambda i: (0, 0),
                                               pipeline_mode=pl.Buffered(1))
        else:
            const = lambda shape: pl.BlockSpec(shape, lambda i: (0, 0))
        call = pl.pallas_call(
            kernel,
            out_shape=jax.ShapeDtypeStruct((bp, Cp), jnp.bfloat16),
            grid_spec=pltpu.PrefetchScalarGridSpec(
                num_scalar_prefetch=0,
                grid=(bp // tb,),
                in_specs=[
                    pl.BlockSpec((tb, D), lambda i: (i, 0)),      # streamed activations
                    const(wab.shape), const(bab.shape),
                    const(wct.shape), const(wcb.shape), const(bc.shape),
                ],
                out_specs=pl.BlockSpec((tb, Cp), lambda i: (i, 0)),
            ),
            compiler_params=pltpu.CompilerParams(
                dimension_semantics=("parallel",),                # v7x: 2 TCs split batch
                vmem_limit_bytes=vmem_limit,
            ),
        )
        out = call(xp, wab, bab, wct, wcb, bc)
        return jax.block_until_ready(out)

    try:
        out_padded = _run(True)
    except Exception:
        # Fallback if this jax build rejects pl.Buffered(1) on pallas_call BlockSpecs.
        out_padded = _run(False)

    return out_padded[:B, :C].astype(jnp.float32)


def init_fan_params(key, data_vector_length, centroid_vector_length):
    """Deterministic init mimicking nn.Linear (uniform ±1/sqrt(fan_in)), f32."""
    D, C = data_vector_length, centroid_vector_length
    k = jax.random.split(key, 6)

    def lin(kw, kb, fan_in, fan_out):
        bound = 1.0 / jnp.sqrt(jnp.float32(fan_in))
        w = jax.random.uniform(kw, (fan_in, fan_out), jnp.float32, -bound, bound)
        b = jax.random.uniform(kb, (1, fan_out), jnp.float32, -bound, bound)
        return w, b

    wa, ba = lin(k[0], k[1], D, 3 * D)          # self.attn
    ws, bs = lin(k[2], k[3], D, 3 * D)          # self.W_s
    wc, bc = lin(k[4], k[5], 6 * D, C)          # self.attn_combine
    return {"wa": wa, "ba": ba, "ws": ws, "bs": bs, "wc": wc, "bc": bc}


def pack_params(params, data_vector_length, centroid_vector_length):
    """Fuse attn/W_s weights, pad features to 128 multiples, cast weights to bf16."""
    D, C = data_vector_length, centroid_vector_length
    H = 3 * D
    hp = _round_up(H, 128)
    cp = max(128, _round_up(C, 128))

    wa = jnp.zeros((D, hp), jnp.float32).at[:, :H].set(params["wa"])
    ws = jnp.zeros((D, hp), jnp.float32).at[:, :H].set(params["ws"])
    # Padded attn columns get a huge negative bias -> softmax weight exactly 0.
    ba = jnp.full((1, hp), -1e30, jnp.float32).at[:, :H].set(params["ba"])
    # Padded W_s columns get zero weight + zero bias -> relu output exactly 0.
    bs = jnp.zeros((1, hp), jnp.float32).at[:, :H].set(params["bs"])

    wab = jnp.concatenate([wa, ws], axis=1).astype(jnp.bfloat16)   # (D, 2*Hp)
    bab = jnp.concatenate([ba, bs], axis=1)                        # (1, 2*Hp) f32

    wc_top = params["wc"][:H, :]                                   # multiplies q_s
    wc_bot = params["wc"][H:, :]                                   # multiplies attn_applied
    wct = jnp.zeros((hp, cp), jnp.float32).at[:H, :C].set(wc_top).astype(jnp.bfloat16)
    wcb = jnp.zeros((hp, cp), jnp.float32).at[:H, :C].set(wc_bot).astype(jnp.bfloat16)
    bc = jnp.zeros((1, cp), jnp.float32).at[:, :C].set(params["bc"])

    return {"wab": wab, "bab": bab, "wct": wct, "wcb": wcb, "bc": bc,
            "hp": hp, "c": C}


def reference_fan(x, params):
    """Pure-JAX f32 reference for correctness check."""
    a = x @ params["wa"] + params["ba"]
    attn_weights = jax.nn.softmax(a, axis=1)
    q_s = jnp.maximum(x @ params["ws"] + params["bs"], 0.0)
    applied = attn_weights * q_s
    comb = jnp.concatenate([q_s, applied], axis=1)
    return comb @ params["wc"] + params["bc"]


if __name__ == "__main__":
    # Small shapes consistent with the module: Data_Vector_Length=32,
    # centord_Vector_Length=16, batch=8.
    B, D, C = 8, 32, 16
    key = jax.random.PRNGKey(0)
    kx, kp = jax.random.split(key)
    x = jax.random.normal(kx, (B, D), jnp.float32)

    params = init_fan_params(kp, D, C)
    packed = pack_params(params, D, C)

    out = prototypical_net_fan(x, packed)
    out = jax.block_until_ready(out)

    ref = reference_fan(x, params)
    assert out.shape == (B, C)
    # bf16 MXU operands / bf16 output + approx reciprocal -> loosened tolerance.
    assert jnp.allclose(out, ref, atol=5e-2, rtol=5e-2), "mismatch vs reference"

    print("KERNEL_OK")
</pallas_src>

<mosaic_0001>
module attributes {stable_mosaic.version = 11 : i64} {
  func.func @fan_kernel(%arg0: i32, %arg1: memref<16x32xf32, #tpu.memory_space<vmem>>, %arg2: memref<32x256xbf16, #tpu.memory_space<vmem>>, %arg3: memref<1x256xf32, #tpu.memory_space<vmem>>, %arg4: memref<128x128xbf16, #tpu.memory_space<vmem>>, %arg5: memref<128x128xbf16, #tpu.memory_space<vmem>>, %arg6: memref<1x128xf32, #tpu.memory_space<vmem>>, %arg7: memref<16x128xbf16, #tpu.memory_space<vmem>>) attributes {dimension_semantics = [#tpu.dimension_semantics<parallel>], iteration_bounds = array<i64: 1>, scalar_prefetch = 0 : i64, scratch_operands = 0 : i64, tpu.core_type = #tpu.core_type<tc>, window_params = [{transform_indices = @transform_0, window_bounds = array<i64: 16, 32>}, {pipeline_mode = #tpu.pipeline_mode<synchronous>, transform_indices = @transform_1, window_bounds = array<i64: 32, 256>}, {pipeline_mode = #tpu.pipeline_mode<synchronous>, transform_indices = @transform_2, window_bounds = array<i64: 1, 256>}, {pipeline_mode = #tpu.pipeline_mode<synchronous>, transform_indices = @transform_3, window_bounds = array<i64: 128, 128>}, {pipeline_mode = #tpu.pipeline_mode<synchronous>, transform_indices = @transform_4, window_bounds = array<i64: 128, 128>}, {pipeline_mode = #tpu.pipeline_mode<synchronous>, transform_indices = @transform_5, window_bounds = array<i64: 1, 128>}, {transform_indices = @transform_6, window_bounds = array<i64: 16, 128>}]} {
    %c0 = arith.constant 0 : index
    %c0_0 = arith.constant 0 : index
    %0 = vector.load %arg1[%c0, %c0_0] : memref<16x32xf32, #tpu.memory_space<vmem>>, vector<16x32xf32>
    %1 = arith.truncf %0 : vector<16x32xf32> to vector<16x32xbf16>
    %c0_1 = arith.constant 0 : index
    %c0_2 = arith.constant 0 : index
    %2 = vector.load %arg2[%c0_1, %c0_2] : memref<32x256xbf16, #tpu.memory_space<vmem>>, vector<32x256xbf16>
    %cst = arith.constant dense<0.000000e+00> : vector<16x256xf32>
    %3 = tpu.matmul %1, %2, %cst {dimension_numbers = #tpu.dot_dimension_numbers<[1], [0], [0], [1], [0, 0, 1, 1], [], []>} : vector<16x32xbf16>, vector<32x256xbf16>, vector<16x256xf32> -> vector<16x256xf32>
    %c0_3 = arith.constant 0 : index
    %c0_4 = arith.constant 0 : index
    %4 = vector.load %arg3[%c0_3, %c0_4] : memref<1x256xf32, #tpu.memory_space<vmem>>, vector<1x256xf32>
    %5 = vector.broadcast %4 : vector<1x256xf32> to vector<16x256xf32>
    %6 = arith.addf %3, %5 : vector<16x256xf32>
    %7 = vector.extract_strided_slice %6 {offsets = [0, 0], sizes = [16, 128], strides = [1, 1]} : vector<16x256xf32> to vector<16x128xf32>
    %8 = vector.extract_strided_slice %6 {offsets = [0, 128], sizes = [16, 128], strides = [1, 1]} : vector<16x256xf32> to vector<16x128xf32>
    %cst_5 = arith.constant dense<0xFF800000> : vector<16xf32>
    %9 = vector.multi_reduction <maximumf>, %7, %cst_5 [1] : vector<16x128xf32> to vector<16xf32>
    %10 = vector.shape_cast %9 : vector<16xf32> to vector<16x1xf32>
    %11 = vector.broadcast %10 : vector<16x1xf32> to vector<16x128xf32>
    %12 = arith.subf %7, %11 : vector<16x128xf32>
    %13 = math.exp %12 : vector<16x128xf32>
    %cst_6 = arith.constant dense<0.000000e+00> : vector<16xf32>
    %14 = vector.multi_reduction <add>, %13, %cst_6 [1] : vector<16x128xf32> to vector<16xf32>
    %15 = vector.shape_cast %14 : vector<16xf32> to vector<16x1xf32>
    %16 = tpu.reciprocal %15 {approx = true} : vector<16x1xf32> -> vector<16x1xf32>
    %cst_7 = arith.constant 0.000000e+00 : f32
    %17 = vector.broadcast %cst_7 : f32 to vector<16x128xf32>
    %18 = arith.maximumf %8, %17 : vector<16x128xf32>
    %19 = arith.truncf %18 : vector<16x128xf32> to vector<16x128xbf16>
    %20 = vector.broadcast %16 : vector<16x1xf32> to vector<16x128xf32>
    %21 = arith.mulf %13, %20 : vector<16x128xf32>
    %22 = arith.truncf %21 : vector<16x128xf32> to vector<16x128xbf16>
    %23 = arith.mulf %22, %19 : vector<16x128xbf16>
    %c0_8 = arith.constant 0 : index
    %c0_9 = arith.constant 0 : index
    %24 = vector.load %arg4[%c0_8, %c0_9] : memref<128x128xbf16, #tpu.memory_space<vmem>>, vector<128x128xbf16>
    %cst_10 = arith.constant dense<0.000000e+00> : vector<16x128xf32>
    %25 = tpu.matmul %19, %24, %cst_10 {dimension_numbers = #tpu.dot_dimension_numbers<[1], [0], [0], [1], [0, 0, 1, 1], [], []>} : vector<16x128xbf16>, vector<128x128xbf16>, vector<16x128xf32> -> vector<16x128xf32>
    %c0_11 = arith.constant 0 : index
    %c0_12 = arith.constant 0 : index
    %26 = vector.load %arg5[%c0_11, %c0_12] : memref<128x128xbf16, #tpu.memory_space<vmem>>, vector<128x128xbf16>
    %cst_13 = arith.constant dense<0.000000e+00> : vector<16x128xf32>
    %27 = tpu.matmul %23, %26, %cst_13 {dimension_numbers = #tpu.dot_dimension_numbers<[1], [0], [0], [1], [0, 0, 1, 1], [], []>} : vector<16x128xbf16>, vector<128x128xbf16>, vector<16x128xf32> -> vector<16x128xf32>
    %28 = arith.addf %25, %27 : vector<16x128xf32>
    %c0_14 = arith.constant 0 : index
    %c0_15 = arith.constant 0 : index
    %29 = vector.load %arg6[%c0_14, %c0_15] : memref<1x128xf32, #tpu.memory_space<vmem>>, vector<1x128xf32>
    %30 = vector.broadcast %29 : vector<1x128xf32> to vector<16x128xf32>
    %31 = arith.addf %28, %30 : vector<16x128xf32>
    %32 = arith.truncf %31 : vector<16x128xf32> to vector<16x128xbf16>
    %c0_16 = arith.constant 0 : index
    %c0_17 = arith.constant 0 : index
    %33 = vector.load %arg7[%c0_16, %c0_17] : memref<16x128xbf16, #tpu.memory_space<vmem>>, vector<16x128xbf16>
    tpu.vector_store %arg7[%c0_16, %c0_17], %32 {strides = array<i32>} : memref<16x128xbf16, #tpu.memory_space<vmem>>, vector<16x128xbf16>,
    return
  }
  func.func @transform_0(%arg0: i32) -> (i32, i32) {
    %c0_i32 = arith.constant 0 : i32
    %c0_i32_0 = arith.constant 0 : i32
    return %arg0, %c0_i32 : i32, i32
  }
  func.func @transform_1(%arg0: i32) -> (i32, i32) {
    %c0_i32 = arith.constant 0 : i32
    %c0_i32_0 = arith.constant 0 : i32
    %c0_i32_1 = arith.constant 0 : i32
    return %c0_i32, %c0_i32_0 : i32, i32
  }
  func.func @transform_2(%arg0: i32) -> (i32, i32) {
    %c0_i32 = arith.constant 0 : i32
    %c0_i32_0 = arith.constant 0 : i32
    %c0_i32_1 = arith.constant 0 : i32
    return %c0_i32, %c0_i32_0 : i32, i32
  }
  func.func @transform_3(%arg0: i32) -> (i32, i32) {
    %c0_i32 = arith.constant 0 : i32
    %c0_i32_0 = arith.constant 0 : i32
    %c0_i32_1 = arith.constant 0 : i32
    return %c0_i32, %c0_i32_0 : i32, i32
  }
  func.func @transform_4(%arg0: i32) -> (i32, i32) {
    %c0_i32 = arith.constant 0 : i32
    %c0_i32_0 = arith.constant 0 : i32
    %c0_i32_1 = arith.constant 0 : i32
    return %c0_i32, %c0_i32_0 : i32, i32
  }
  func.func @transform_5(%arg0: i32) -> (i32, i32) {
    %c0_i32 = arith.constant 0 : i32
    %c0_i32_0 = arith.constant 0 : i32
    %c0_i32_1 = arith.constant 0 : i32
    return %c0_i32, %c0_i32_0 : i32, i32
  }
  func.func @transform_6(%arg0: i32) -> (i32, i32) {
    %c0_i32 = arith.constant 0 : i32
    %c0_i32_0 = arith.constant 0 : i32
    return %arg0, %c0_i32 : i32, i32
  }
}

module attributes {stable_mosaic.version = 11 : i64} {
  func.func @fan_kernel(%arg0: i32, %arg1: memref<16x32xf32, #tpu.memory_space<vmem>>, %arg2: memref<32x256xbf16, #tpu.memory_space<vmem>>, %arg3: memref<1x256xf32, #tpu.memory_space<vmem>>, %arg4: memref<128x128xbf16, #tpu.memory_space<vmem>>, %arg5: memref<128x128xbf16, #tpu.memory_space<vmem>>, %arg6: memref<1x128xf32, #tpu.memory_space<vmem>>, %arg7: memref<16x128xbf16, #tpu.memory_space<vmem>>) attributes {dimension_semantics = [#tpu.dimension_semantics<parallel>], iteration_bounds = array<i64: 1>, scalar_prefetch = 0 : i64, scratch_operands = 0 : i64, tpu.core_type = #tpu.core_type<tc>, window_params = [{transform_indices = @transform_0, window_bounds = array<i64: 16, 32>}, {pipeline_mode = #tpu.pipeline_mode<synchronous>, transform_indices = @transform_1, window_bounds = array<i64: 32, 256>}, {pipeline_mode = #tpu.pipeline_mode<synchronous>, transform_indices = @transform_2, window_bounds = array<i64: 1, 256>}, {pipeline_mode = #tpu.pipeline_mode<synchronous>, transform_indices = @transform_3, window_bounds = array<i64: 128, 128>}, {pipeline_mode = #tpu.pipeline_mode<synchronous>, transform_indices = @transform_4, window_bounds = array<i64: 128, 128>}, {pipeline_mode = #tpu.pipeline_mode<synchronous>, transform_indices = @transform_5, window_bounds = array<i64: 1, 128>}, {transform_indices = @transform_6, window_bounds = array<i64: 16, 128>}]} {
    %c0 = arith.constant 0 : index
    %c0_0 = arith.constant 0 : index
    %0 = vector.load %arg1[%c0, %c0_0] : memref<16x32xf32, #tpu.memory_space<vmem>>, vector<16x32xf32>
    %1 = arith.truncf %0 : vector<16x32xf32> to vector<16x32xbf16>
    %c0_1 = arith.constant 0 : index
    %c0_2 = arith.constant 0 : index
    %2 = vector.load %arg2[%c0_1, %c0_2] : memref<32x256xbf16, #tpu.memory_space<vmem>>, vector<32x256xbf16>
    %cst = arith.constant dense<0.000000e+00> : vector<16x256xf32>
    %3 = tpu.matmul %1, %2, %cst {dimension_numbers = #tpu.dot_dimension_numbers<[1], [0], [0], [1], [0, 0, 1, 1], [], []>} : vector<16x32xbf16>, vector<32x256xbf16>, vector<16x256xf32> -> vector<16x256xf32>
    %c0_3 = arith.constant 0 : index
    %c0_4 = arith.constant 0 : index
    %4 = vector.load %arg3[%c0_3, %c0_4] : memref<1x256xf32, #tpu.memory_space<vmem>>, vector<1x256xf32>
    %5 = vector.broadcast %4 : vector<1x256xf32> to vector<16x256xf32>
    %6 = arith.addf %3, %5 : vector<16x256xf32>
    %7 = vector.extract_strided_slice %6 {offsets = [0, 0], sizes = [16, 128], strides = [1, 1]} : vector<16x256xf32> to vector<16x128xf32>
    %8 = vector.extract_strided_slice %6 {offsets = [0, 128], sizes = [16, 128], strides = [1, 1]} : vector<16x256xf32> to vector<16x128xf32>
    %cst_5 = arith.constant dense<0xFF800000> : vector<16xf32>
    %9 = vector.multi_reduction <maximumf>, %7, %cst_5 [1] : vector<16x128xf32> to vector<16xf32>
    %10 = vector.shape_cast %9 : vector<16xf32> to vector<16x1xf32>
    %11 = vector.broadcast %10 : vector<16x1xf32> to vector<16x128xf32>
    %12 = arith.subf %7, %11 : vector<16x128xf32>
    %13 = math.exp %12 : vector<16x128xf32>
    %cst_6 = arith.constant dense<0.000000e+00> : vector<16xf32>
    %14 = vector.multi_reduction <add>, %13, %cst_6 [1] : vector<16x128xf32> to vector<16xf32>
    %15 = vector.shape_cast %14 : vector<16xf32> to vector<16x1xf32>
    %16 = tpu.reciprocal %15 {approx = true} : vector<16x1xf32> -> vector<16x1xf32>
    %cst_7 = arith.constant 0.000000e+00 : f32
    %17 = vector.broadcast %cst_7 : f32 to vector<16x128xf32>
    %18 = arith.maximumf %8, %17 : vector<16x128xf32>
    %19 = arith.truncf %18 : vector<16x128xf32> to vector<16x128xbf16>
    %20 = vector.broadcast %16 : vector<16x1xf32> to vector<16x128xf32>
    %21 = arith.mulf %13, %20 : vector<16x128xf32>
    %22 = arith.truncf %21 : vector<16x128xf32> to vector<16x128xbf16>
    %23 = arith.mulf %22, %19 : vector<16x128xbf16>
    %c0_8 = arith.constant 0 : index
    %c0_9 = arith.constant 0 : index
    %24 = vector.load %arg4[%c0_8, %c0_9] : memref<128x128xbf16, #tpu.memory_space<vmem>>, vector<128x128xbf16>
    %cst_10 = arith.constant dense<0.000000e+00> : vector<16x128xf32>
    %25 = tpu.matmul %19, %24, %cst_10 {dimension_numbers = #tpu.dot_dimension_numbers<[1], [0], [0], [1], [0, 0, 1, 1], [], []>} : vector<16x128xbf16>, vector<128x128xbf16>, vector<16x128xf32> -> vector<16x128xf32>
    %c0_11 = arith.constant 0 : index
    %c0_12 = arith.constant 0 : index
    %26 = vector.load %arg5[%c0_11, %c0_12] : memref<128x128xbf16, #tpu.memory_space<vmem>>, vector<128x128xbf16>
    %cst_13 = arith.constant dense<0.000000e+00> : vector<16x128xf32>
    %27 = tpu.matmul %23, %26, %cst_13 {dimension_numbers = #tpu.dot_dimension_numbers<[1], [0], [0], [1], [0, 0, 1, 1], [], []>} : vector<16x128xbf16>, vector<128x128xbf16>, vector<16x128xf32> -> vector<16x128xf32>
    %28 = arith.addf %25, %27 : vector<16x128xf32>
    %c0_14 = arith.constant 0 : index
    %c0_15 = arith.constant 0 : index
    %29 = vector.load %arg6[%c0_14, %c0_15] : memref<1x128xf32, #tpu.memory_space<vmem>>, vector<1x128xf32>
    %30 = vector.broadcast %29 : vector<1x128xf32> to vector<16x128xf32>
    %31 = arith.addf %28, %30 : vector<16x128xf32>
    %32 = arith.truncf %31 : vector<16x128xf32> to vector<16x128xbf16>
    %c0_16 = arith.constant 0 : index
    %c0_17 = arith.constant 0 : index
    %33 = vector.load %arg7[%c0_16, %c0_17] : memref<16x128xbf16, #tpu.memory_space<vmem>>, vector<16x128xbf16>
    tpu.vector_store %arg7[%c0_16, %c0_17], %32 {strides = array<i32>} : memref<16x128xbf16, #tpu.memory_space<vmem>>, vector<16x128xbf16>,
    return
  }
  func.func @transform_0(%arg0: i32) -> (i32, i32) {
    %c0_i32 = arith.constant 0 : i32
    %c0_i32_0 = arith.constant 0 : i32
    return %arg0, %c0_i32 : i32, i32
  }
  func.func @transform_1(%arg0: i32) -> (i32, i32) {
    %c0_i32 = arith.constant 0 : i32
    %c0_i32_0 = arith.constant 0 : i32
    %c0_i32_1 = arith.constant 0 : i32
    return %c0_i32, %c0_i32_0 : i32, i32
  }
  func.func @transform_2(%arg0: i32) -> (i32, i32) {
    %c0_i32 = arith.constant 0 : i32
    %c0_i32_0 = arith.constant 0 : i32
    %c0_i32_1 = arith.constant 0 : i32
    return %c0_i32, %c0_i32_0 : i32, i32
  }
  func.func @transform_3(%arg0: i32) -> (i32, i32) {
    %c0_i32 = arith.constant 0 : i32
    %c0_i32_0 = arith.constant 0 : i32
    %c0_i32_1 = arith.constant 0 : i32
    return %c0_i32, %c0_i32_0 : i32, i32
  }
  func.func @transform_4(%arg0: i32) -> (i32, i32) {
    %c0_i32 = arith.constant 0 : i32
    %c0_i32_0 = arith.constant 0 : i32
    %c0_i32_1 = arith.constant 0 : i32
    return %c0_i32, %c0_i32_0 : i32, i32
  }
  func.func @transform_5(%arg0: i32) -> (i32, i32) {
    %c0_i32 = arith.constant 0 : i32
    %c0_i32_0 = arith.constant 0 : i32
    %c0_i32_1 = arith.constant 0 : i32
    return %c0_i32, %c0_i32_0 : i32, i32
  }
  func.func @transform_6(%arg0: i32) -> (i32, i32) {
    %c0_i32 = arith.constant 0 : i32
    %c0_i32_0 = arith.constant 0 : i32
    return %arg0, %c0_i32 : i32, i32
  }
}

</mosaic_0001>

<bundles_post_ra>
// kernel: tpu_custom_call.1
= control target key start
LH: loop header
LB: loop body
LE: loop exit
PB: predicated region body
PF: predicated region fallthrough
CT: control target
= control target key end

     0   :  { %11 = vsyncpa [#allocation3], 0  ;;  %s931_s0 = inlined_call_operand.hbm [shape: f32[16,32], index: 0, kind: input, shape index: {}]   ;;  %s932_s1 = inlined_call_operand.hbm [shape: bf16[32,256], index: 1, kind: input, shape index: {}]   ;;  %s933_s2 = inlined_call_operand.hbm [shape: f32[1,256], index: 2, kind: input, shape index: {}]   ;;  %s934_s3 = inlined_call_operand.hbm [shape: bf16[128,128], index: 3, kind: input, shape index: {}]   ;;  %s935_s4 = inlined_call_operand.hbm [shape: bf16[128,128], index: 4, kind: input, shape index: {}]   ;;  %s936_s5 = inlined_call_operand.hbm [shape: f32[1,128], index: 5, kind: input, shape index: {}]   ;;  %s937_s6 = inlined_call_operand.hbm [shape: bf16[16,128], index: 6, kind: output, shape index: {}]  }
   0x1   :  { %12 = vsyncpa [#allocation6], 0 }
   0x2   :  { %13 = vsyncpa [#allocation9], 0 }
   0x3   :  { %14 = vsyncpa [#allocation12], 0 }
   0x4   :  { %15 = vsyncpa [#allocation4], 0  ;;  %s758_s21 = smov [#allocation5]   ;;  %s759_s23 = smov [#allocation8]  }
   0x5   :  { %s33_s22 = sshll.u32 %s758_s21, 4  ;;  %s55_s24 = sshll.u32 %s759_s23, 4  ;;  %s34_s22 = int_to_ptr.vmem [resolvable:$true] %s33_s22  ;;  %s807_s24 = int_to_ptr.vmem [resolvable:$true] %s55_s24 }
   0x6   :  { %s594_s27 = scalar_lea.hbm %s932_s1, 512 }
   0x7   :  { %p595_p0 = scmp.ne.s32.totalorder %s932_s1, %s594_s27  ;;  %p598_p1 = scmp.lt.u32.totalorder %s594_s27, %s932_s1 }
   0x9   :  { %p600_p2 = pnand %p598_p1, %p595_p0 }
   0xb   :  { %603 = shalt.err (!%p600_p2)
}
   0xc   :  { %s604_s8 = scalar_lea.vmem %s34_s22, 512  ;;  %p609_p4 = scmp.lt.s32.totalorder %s34_s22, %s34_s22 }
   0xd   :  { %p605_p3 = scmp.ne.s32.totalorder %s34_s22, %s604_s8  ;;  %p610_p5 = scmp.lt.s32.totalorder %s604_s8, %s604_s8 }
   0xf   :  { %p611_p6 = por %p610_p5, %p609_p4 }
  0x11   :  { %p612_p7 = pnand %p611_p6, %p605_p3 }
  0x13   :  { %615 = shalt.err (!%p612_p7)
}
  0x14   :  { %s760_s9 = smov 128   ;;  %s761_s10 = smov 8  }
  0x15   :  { %39 = dma.hbm_to_vmem [thread:$0]  %s932_s1, 512, %s34_s22, [#allocation6], %s760_s9, %s760_s9, %s761_s10  }
  0x16   :  { %s616_s15 = scalar_lea.hbm %s934_s3, 1024 }
  0x17   :  { %p617_p8 = scmp.ne.s32.totalorder %s934_s3, %s616_s15  ;;  %p620_p9 = scmp.lt.u32.totalorder %s616_s15, %s934_s3 }
  0x19   :  { %p622_p10 = pnand %p620_p9, %p617_p8 }
  0x1b   :  { %625 = shalt.err (!%p622_p10)
}
  0x1c   :  { %s626_s20 = scalar_lea.vmem %s807_s24, 1024  ;;  %p631_p12 = scmp.lt.s32.totalorder %s807_s24, %s807_s24 }
  0x1d   :  { %p627_p11 = scmp.ne.s32.totalorder %s807_s24, %s626_s20  ;;  %p632_p13 = scmp.lt.s32.totalorder %s626_s20, %s626_s20 }
  0x1f   :  { %p633_p0 = por %p632_p13, %p631_p12 }
  0x21   :  { %p634_p1 = pnand %p633_p0, %p627_p11 }
  0x23   :  { %637 = shalt.err (!%p634_p1)
}
  0x24   :  { %s762_s1 = smov 64   ;;  %s763_s21 = smov 4  }
  0x25   :  { %61 = dma.hbm_to_vmem [thread:$0]  %s934_s3, 1024, %s807_s24, [#allocation9], %s762_s1, %s762_s1, %s763_s21  }
  0x26   :  { %s764_s25 = smov [#allocation2]   ;;  %s765_s27 = smov [#allocation7]  }
  0x27   :  { %s21_s26 = sshll.u32 %s764_s25, 4  ;;  %s46_s28 = sshll.u32 %s765_s27, 4  ;;  %s22_s26 = int_to_ptr.vmem [resolvable:$true] %s21_s26  ;;  %s47_s28 = int_to_ptr.vmem [resolvable:$true] %s46_s28 }
  0x28   :  { %s638_s7 = scalar_lea.hbm %s931_s0, 256 }
  0x29   :  { %p639_p2 = scmp.ne.s32.totalorder %s931_s0, %s638_s7  ;;  %p642_p3 = scmp.lt.u32.totalorder %s638_s7, %s931_s0 }
  0x2b   :  { %p644_p4 = pnand %p642_p3, %p639_p2 }
  0x2d   :  { %647 = shalt.err (!%p644_p4)
}
  0x2e   :  { %s648_s3 = scalar_lea.vmem %s22_s26, 256  ;;  %p653_p6 = scmp.lt.s32.totalorder %s22_s26, %s22_s26 }
  0x2f   :  { %p649_p5 = scmp.ne.s32.totalorder %s22_s26, %s648_s3  ;;  %p654_p7 = scmp.lt.s32.totalorder %s648_s3, %s648_s3 }
  0x31   :  { %p655_p8 = por %p654_p7, %p653_p6 }
  0x33   :  { %p656_p9 = pnand %p655_p8, %p649_p5 }
  0x35   :  { %659 = shalt.err (!%p656_p9)
}
  0x36   :  { %27 = dma.hbm_to_vmem [thread:$0]  %s931_s0, 256, %s22_s26, [#allocation3], %s760_s9, %s760_s9, %s761_s10  }
  0x37   :  { %s660_s17 = scalar_lea.hbm %s933_s2, 32 }
  0x38   :  { %p661_p10 = scmp.ne.s32.totalorder %s933_s2, %s660_s17  ;;  %p664_p11 = scmp.lt.u32.totalorder %s660_s17, %s933_s2 }
  0x3a   :  { %p666_p12 = pnand %p664_p11, %p661_p10 }
  0x3c   :  { %669 = shalt.err (!%p666_p12)
}
  0x3d   :  { %s670_s23 = scalar_lea.vmem %s47_s28, 32  ;;  %p675_p0 = scmp.lt.s32.totalorder %s47_s28, %s47_s28 }
  0x3e   :  { %p671_p13 = scmp.ne.s32.totalorder %s47_s28, %s670_s23  ;;  %p676_p1 = scmp.lt.s32.totalorder %s670_s23, %s670_s23 }
  0x40   :  { %p677_p2 = por %p676_p1, %p675_p0 }
  0x42   :  { %p678_p3 = pnand %p677_p2, %p671_p13 }
  0x44   :  { %681 = shalt.err (!%p678_p3)
}
  0x45   :  { %49 = dma.hbm_to_vmem [thread:$0]  %s933_s2, 32, %s47_s28, [#allocation6]  }
  0x46   :  { %s766_s10 = smov [#allocation10]   ;;  %s767_s26 = smov [#allocation11]  }
  0x47   :  { %s67_s25 = sshll.u32 %s766_s10, 4  ;;  %s80_s27 = sshll.u32 %s767_s26, 4  ;;  %s68_s25 = int_to_ptr.vmem [resolvable:$true] %s67_s25  ;;  %s81_s27 = int_to_ptr.vmem [resolvable:$true] %s80_s27 }
  0x48   :  { %s682_s7 = scalar_lea.hbm %s935_s4, 1024 }
  0x49   :  { %p683_p4 = scmp.ne.s32.totalorder %s935_s4, %s682_s7  ;;  %p686_p5 = scmp.lt.u32.totalorder %s682_s7, %s935_s4 }
  0x4b   :  { %p688_p6 = pnand %p686_p5, %p683_p4 }
  0x4d   :  { %691 = shalt.err (!%p688_p6)
}
  0x4e   :  { %s692_s2 = scalar_lea.vmem %s68_s25, 1024  ;;  %p697_p8 = scmp.lt.s32.totalorder %s68_s25, %s68_s25 }
  0x4f   :  { %p693_p7 = scmp.ne.s32.totalorder %s68_s25, %s692_s2  ;;  %p698_p9 = scmp.lt.s32.totalorder %s692_s2, %s692_s2 }
  0x51   :  { %p699_p10 = por %p698_p9, %p697_p8 }
  0x53   :  { %p700_p11 = pnand %p699_p10, %p693_p7 }
  0x55   :  { %703 = shalt.err (!%p700_p11)
}
  0x56   :  { %73 = dma.hbm_to_vmem [thread:$0]  %s935_s4, 1024, %s68_s25, [#allocation9], %s762_s1, %s762_s1, %s763_s21  }
  0x57   :  { %s704_s15 = scalar_lea.hbm %s936_s5, 16 }
  0x58   :  { %p705_p12 = scmp.ne.s32.totalorder %s936_s5, %s704_s15  ;;  %p708_p13 = scmp.lt.u32.totalorder %s704_s15, %s936_s5 }
  0x5a   :  { %p710_p0 = pnand %p708_p13, %p705_p12 }
  0x5c   :  { %713 = shalt.err (!%p710_p0)
}
  0x5d   :  { %s714_s20 = scalar_lea.vmem %s81_s27, 16  ;;  %s718_s22 = scalar_lea.vmem %s81_s27, 32 }
  0x5e   :  { %p715_p1 = scmp.ne.s32.totalorder %s81_s27, %s714_s20  ;;  %p719_p2 = scmp.lt.s32.totalorder %s81_s27, %s81_s27 }
  0x5f   :  { %p720_p3 = scmp.lt.s32.totalorder %s718_s22, %s714_s20 }
  0x61   :  { %p721_p4 = por %p720_p3, %p719_p2 }
  0x63   :  { %p722_p5 = pnand %p721_p4, %p715_p1 }
  0x65   :  { %725 = shalt.err (!%p722_p5)
}
  0x66   :  { %83 = dma.hbm_to_vmem [thread:$0]  %s936_s5, 16, %s81_s27, [#allocation12]  }
  0x67   :  { %748 = dma.done.wait [#allocation3], 256  }
  0x68   :  { %749 = vsyncadd [#allocation3], 4294967040 }
  0x69   :  { %750 = dma.done.wait [#allocation6], 544  }
  0x6a   :  { %751 = vsyncadd [#allocation6], 4294966752 }
  0x6b   :  { %752 = dma.done.wait [#allocation9], 2048  }
  0x6c   :  { %753 = vsyncadd [#allocation9], 4294965248 }
  0x6d   :  { %754 = dma.done.wait [#allocation12], 16  }
  0x6e   :  { %755 = vsyncadd [#allocation12], 4294967280  ;;  %v768_v0 = vmov 0   ;;  %v769_v1 = vmov 0.0   ;;  %v564_v2 = vld [vmem:[#allocation5 + $0x4] ss:$8 sps:$4 sm:$0xff]   ;;  %v112_v17 = vlaneseq }
  0x6f   :  { %178 = vmatprep.mubr.bf16.mxu0 %v768_v0  ;;  %510 = vmatprep.subr.bf16.mxu1 %v769_v1  ;;  %v566_v3 = vld [vmem:[#allocation5] ss:$8 sps:$4 sm:$0xff]   ;;  %v567_v4 = vld [vmem:[#allocation5 + $0x14] ss:$8 sps:$4 sm:$0xff]   ;;  %v569_v5 = vld [vmem:[#allocation5 + $0x10] ss:$8 sps:$4 sm:$0xff]  }
  0x70   :  { %146 = vmatprep.subr.bf16.mxu0 %v564_v2  ;;  %v103_v6 = vld [vmem:[#allocation2] sm:$0xff]  ;;  %v104_v7 = vld [vmem:[#allocation2 + $0x8] sm:$0xff]  ;;  %vm142_vm0 = vcmask 261120   ;;  %v570_v9 = vld [vmem:[#allocation8] sm:$0xff]   ;;  %vm770_vm1 = vmmov 0   ;;  %v113_v18 = vshrl.u32 %v112_v17, 7 }
  0x71   :  { %147 = vmatpush1.bf16.msra.mxu0 %v566_v3  ;;  %v105_v8 = vpack.c.bf16 %v104_v7, %v103_v6  ;;  %v571_v10 = vld [vmem:[#allocation8 + $0x8] sm:$0xff]   ;;  %v572_v11 = vld [vmem:[#allocation8 + $0x10] sm:$0xff]   ;;  %v573_v12 = vld [vmem:[#allocation8 + $0x18] sm:$0xff]   ;;  %526 = vmatprep.mubr.msk.bf16.mxu1 %vm770_vm1, %v769_v1  ;;  %s771_s5 = smov [#allocation13]  }
  0x72   :  { %148 = vmatprep.subr.bf16.mxu0 %v567_v4  ;;  %v574_v13 = vld [vmem:[#allocation8 + $0x20] sm:$0xff]   ;;  %v575_v14 = vld [vmem:[#allocation8 + $0x28] sm:$0xff]   ;;  %v576_v15 = vld [vmem:[#allocation8 + $0x30] sm:$0xff]   ;;  %v114_v19 = vsub.s32 0, %v113_v18  ;;  %v118_v21 = vsub.s32 1, %v113_v18  ;;  %s446_s0 = sshll.u32 %s771_s5, 4  ;;  %s447_s0 = int_to_ptr.vmem [resolvable:$true] %s446_s0 }
  0x73   :  { %v577_v16 = vld [vmem:[#allocation8 + $0x38] sm:$0xff]   ;;  %v578_v35 = vld [vmem:[#allocation10] sm:$0xff]   ;;  %v579_v36 = vld [vmem:[#allocation10 + $0x8] sm:$0xff]   ;;  %s726_s9 = scalar_lea.vmem %s447_s0, 128  ;;  %p731_p7 = scmp.lt.s32.totalorder %s447_s0, %s447_s0 }
  0x74   :  { %v110_v20 = vld [vmem:[#allocation7] sm:$0x3]  ;;  %511 = vmatpush3.bf16.msra.mxu1 %v578_v35  ;;  %v580_v37 = vld [vmem:[#allocation10 + $0x10] sm:$0xff]   ;;  %v582_v47 = vld [vmem:[#allocation10 + $0x20] sm:$0xff]   ;;  %p727_p6 = scmp.ne.s32.totalorder %s447_s0, %s726_s9  ;;  %p732_p8 = scmp.lt.s32.totalorder %s726_s9, %s726_s9 }
  0x75   :  { %149 = vmatpush1.bf16.msra.mxu0 %v569_v5  ;;  %v115_v22 = vrot.slane %v110_v20, %v114_v19  ;;  %v119_v23 = vrot.slane %v110_v20, %v118_v21  ;;  %512 = vmatprep.subr.bf16.mxu1 %v769_v1  ;;  %v581_v46 = vld [vmem:[#allocation10 + $0x18] sm:$0xff]   ;;  %v583_v48 = vld [vmem:[#allocation10 + $0x28] sm:$0xff]   ;;  %v584_v49 = vld [vmem:[#allocation10 + $0x30] sm:$0xff]  }
  0x76   :  { %530 = vmatprep.subr.bf16.mxu0 %v769_v1  ;;  %v585_v50 = vld [vmem:[#allocation10 + $0x38] sm:$0xff]   ;;  %p733_p9 = por %p732_p8, %p731_p7 }
  0x78   :  { %465 = vmatmul.mubr.msk.bf16.vlgmr.msra.gmra.mrb[0].mxu0 %vm142_vm0, %v105_v8  ;;  %513 = vmatpush3.bf16.msra.mxu1 %v579_v36  ;;  %p734_p10 = pnand %p733_p9, %p727_p6 }
  0x79   :  { %531 = vmatpush3.bf16.msra.mxu0 %v570_v9  ;;  %546 = vmatprep.mubr.msk.bf16.mxu0 %vm770_vm1, %v769_v1 }
  0x7a   :  { %532 = vmatprep.subr.bf16.mxu0 %v769_v1  ;;  %514 = vmatprep.subr.bf16.mxu1 %v769_v1 }
  0x7c   :  { %515 = vmatpush3.bf16.msra.mxu1 %v580_v37 }
  0x7d   :  { %533 = vmatpush3.bf16.msra.mxu0 %v571_v10  ;;  %516 = vmatprep.subr.bf16.mxu1 %v769_v1 }
  0x7e   :  { %534 = vmatprep.subr.bf16.mxu0 %v769_v1 }
  0x80   :  { %517 = vmatpush3.bf16.msra.mxu1 %v581_v46 }
  0x81   :  { %535 = vmatpush3.bf16.msra.mxu0 %v572_v11  ;;  %518 = vmatprep.subr.bf16.mxu1 %v769_v1 }
  0x82   :  { %536 = vmatprep.subr.bf16.mxu0 %v769_v1 }
  0x84   :  { %519 = vmatpush3.bf16.msra.mxu1 %v582_v47 }
  0x85   :  { %537 = vmatpush3.bf16.msra.mxu0 %v573_v12  ;;  %520 = vmatprep.subr.bf16.mxu1 %v769_v1 }
  0x86   :  { %538 = vmatprep.subr.bf16.mxu0 %v769_v1 }
  0x88   :  { %521 = vmatpush3.bf16.msra.mxu1 %v583_v48 }
  0x89   :  { %539 = vmatpush3.bf16.msra.mxu0 %v574_v13  ;;  %522 = vmatprep.subr.bf16.mxu1 %v769_v1 }
  0x8a   :  { %540 = vmatprep.subr.bf16.mxu0 %v769_v1 }
  0x8c   :  { %523 = vmatpush3.bf16.msra.mxu1 %v584_v49 }
  0x8d   :  { %541 = vmatpush3.bf16.msra.mxu0 %v575_v14  ;;  %524 = vmatprep.subr.bf16.mxu1 %v769_v1 }
  0x8e   :  { %542 = vmatprep.subr.bf16.mxu0 %v769_v1 }
  0x90   :  { %525 = vmatpush3.bf16.msra.mxu1 %v585_v50 }
  0x91   :  { %543 = vmatpush3.bf16.msra.mxu0 %v576_v15 }
  0x92   :  { %544 = vmatprep.subr.bf16.mxu0 %v769_v1  ;;  %v482_v1 = vld [vmem:[#allocation11] ss:$0 sm:$0xff] }
  0x95   :  { %545 = vmatpush3.bf16.msra.mxu0 %v577_v16 }
 0x14b   :  { %v180_v24 = vpop.f32.mrb[0].mxu0 }
 0x14c   :  { %v181_v25 = vadd.f32 %v180_v24, %v115_v22  ;;  %v182_v26 = vpop.f32.mrb[1].mxu0 }
 0x14d   :  { %v183_v27 = vadd.f32 %v182_v26, %v119_v23  ;;  %v184_v28 = vpop.f32.mrb[2].mxu0 }
 0x14e   :  { %v186_v29 = vpop.f32.mrb[3].mxu0  ;;  %189 = vmax.xlane.f32.xlu0 %v181_v25  ;;  %v185_v31 = vadd.f32 %v184_v28, %v115_v22 }
 0x14f   :  { %v187_v30 = vadd.f32 %v186_v29, %v119_v23  ;;  %v205_v32 = vmax.f32 %v183_v27, 0.0 }
 0x151   :  { %v206_v33 = vmax.f32 %v187_v30, 0.0 }
 0x152   :  { %191 = vmax.xlane.f32.xlu0 %v185_v31 }
 0x153   :  { %v207_v34 = vpack.c.bf16 %v206_v33, %v205_v32 }
 0x155   :  { %547 = vmatmul.mubr.bf16.vlgmr.msra.gmra.mrb[4].mxu0 %v207_v34 }
 0x1db   :  { %v190_v38 = vpop.xlane.xlu0 %189 }
 0x1dc   :  { %v193_v39 = vsub.f32 %v181_v25, %v190_v38 }
 0x1de   :  { %v195_v40 = vmul.f32 1.442695, %v193_v39 }
 0x1df   :  { %v192_v41 = vpop.xlane.xlu0 %191 }
 0x1e0   :  { %586 = vpow2.f32 %v195_v40  ;;  %v194_v42 = vsub.f32 %v185_v31, %v192_v41 }
 0x1e2   :  { %v197_v43 = vmul.f32 1.442695, %v194_v42 }
 0x1e4   :  { %588 = vpow2.f32 %v197_v43 }
 0x1ea   :  { %v587_v44 = vpop.eup %586 }
 0x1eb   :  { %199 = vadd.xlane.f32.xlu1 %v587_v44 }
 0x1ee   :  { %v589_v45 = vpop.eup %588 }
 0x1ef   :  { %201 = vadd.xlane.f32.xlu1 %v589_v45 }
 0x228   :  { %v415_v51 = vpop.f32.mrb[4].mxu0 }
 0x229   :  { %v548_v52 = vpop.f32.mrb[5].mxu0 }
 0x22a   :  { %v418_v53 = vpop.f32.mrb[6].mxu0 }
 0x22b   :  { %v549_v54 = vpop.f32.mrb[7].mxu0 }
 0x278   :  { %v200_v55 = vpop.xlane.xlu1 %199 }
 0x279   :  { %590 = vrcp.f32 %v200_v55 }
 0x27c   :  { %v202_v56 = vpop.xlane.xlu1 %201 }
 0x27d   :  { %592 = vrcp.f32 %v202_v56 }
 0x283   :  { %v591_v57 = vpop.eup %590 }
 0x284   :  { %v208_v59 = vmul.f32 %v591_v57, %v587_v44 }
 0x287   :  { %v593_v58 = vpop.eup %592 }
 0x288   :  { %v209_v60 = vmul.f32 %v593_v58, %v589_v45 }
 0x28a   :  { %v210_v61 = vpack.c.bf16 %v209_v60, %v208_v59 }
 0x28c   :  { %v211_v62 = vmul.bf16 %v210_v61, %v207_v34 }
 0x28e   :  { %527 = vmatmul.mubr.bf16.vlgmr.msra.gmra.mrb[0].mxu1 %v211_v62 }
 0x361   :  { %v326_v63 = vpop.f32.mrb[0].mxu1 }
 0x362   :  { %v416_v0 = vadd.f32 %v415_v51, %v326_v63  ;;  %v528_v2 = vpop.f32.mrb[1].mxu1 }
 0x363   :  { %v329_v3 = vpop.f32.mrb[2].mxu1 }
 0x364   :  { %v419_v4 = vadd.f32 %v418_v53, %v329_v3  ;;  %v529_v5 = vpop.f32.mrb[3].mxu1  ;;  %v429_v6 = vadd.f32 %v482_v1, %v416_v0 }
 0x366   :  { %v430_v7 = vadd.f32 %v482_v1, %v419_v4 }
 0x368   :  { %v490_v8 = vpack.c.bf16 %v430_v7, %v429_v6 }
 0x36a   :  { %491 = vst [vmem:[#allocation13] sm:$0xff] %v490_v8  }
 0x36b   :  { %737 = shalt.err (!%p734_p10)
}
 0x36c   :  { %s738_s26 = scalar_lea.hbm %s937_s6, 128 }
 0x36d   :  { %p739_p11 = scmp.ne.s32.totalorder %s937_s6, %s738_s26  ;;  %p742_p12 = scmp.lt.u32.totalorder %s738_s26, %s937_s6 }
 0x36f   :  { %p744_p13 = pnand %p742_p12, %p739_p11 }
 0x371   :  { %747 = shalt.err (!%p744_p13)
}
 0x372   :  { %452 = dma.vmem_to_hbm [thread:$0]  %s447_s0, 128, %s937_s6, [#allocation4], %s762_s1, %s762_s1, %s763_s21  }
 0x373   :  { %756 = dma.done.wait [#allocation4], 128  }
 0x374   :  { %757 = vsyncadd [#allocation4], 4294967168 }
 0x375   :  { %456 = vsyncpa [#allocation3], 1 }
 0x376   :  { %457 = vsyncpa [#allocation6], 1 }
 0x377   :  { %458 = vsyncpa [#allocation9], 1 }
 0x378   :  { %459 = vsyncpa [#allocation12], 1 }
 0x379   :  { %460 = vsyncpa [#allocation4], 1 }

// kernel: tpu_custom_call.1
= control target key start
LH: loop header
LB: loop body
LE: loop exit
PB: predicated region body
PF: predicated region fallthrough
CT: control target
= control target key end

     0   :  { %11 = vsyncpa [#allocation3], 0  ;;  %s931_s0 = inlined_call_operand.hbm [shape: f32[16,32], index: 0, kind: input, shape index: {}]   ;;  %s932_s1 = inlined_call_operand.hbm [shape: bf16[32,256], index: 1, kind: input, shape index: {}]   ;;  %s933_s2 = inlined_call_operand.hbm [shape: f32[1,256], index: 2, kind: input, shape index: {}]   ;;  %s934_s3 = inlined_call_operand.hbm [shape: bf16[128,128], index: 3, kind: input, shape index: {}]   ;;  %s935_s4 = inlined_call_operand.hbm [shape: bf16[128,128], index: 4, kind: input, shape index: {}]   ;;  %s936_s5 = inlined_call_operand.hbm [shape: f32[1,128], index: 5, kind: input, shape index: {}]   ;;  %s937_s6 = inlined_call_operand.hbm [shape: bf16[16,128], index: 6, kind: output, shape index: {}]  }
   0x1   :  { %12 = vsyncpa [#allocation6], 0 }
   0x2   :  { %13 = vsyncpa [#allocation9], 0 }
   0x3   :  { %14 = vsyncpa [#allocation12], 0 }
   0x4   :  { %15 = vsyncpa [#allocation4], 0  ;;  %s758_s21 = smov [#allocation5]   ;;  %s759_s23 = smov [#allocation8]  }
   0x5   :  { %s33_s22 = sshll.u32 %s758_s21, 4  ;;  %s55_s24 = sshll.u32 %s759_s23, 4  ;;  %s34_s22 = int_to_ptr.vmem [resolvable:$true] %s33_s22  ;;  %s807_s24 = int_to_ptr.vmem [resolvable:$true] %s55_s24 }
   0x6   :  { %s594_s27 = scalar_lea.hbm %s932_s1, 512 }
   0x7   :  { %p595_p0 = scmp.ne.s32.totalorder %s932_s1, %s594_s27  ;;  %p598_p1 = scmp.lt.u32.totalorder %s594_s27, %s932_s1 }
   0x9   :  { %p600_p2 = pnand %p598_p1, %p595_p0 }
   0xb   :  { %603 = shalt.err (!%p600_p2)
}
   0xc   :  { %s604_s8 = scalar_lea.vmem %s34_s22, 512  ;;  %p609_p4 = scmp.lt.s32.totalorder %s34_s22, %s34_s22 }
   0xd   :  { %p605_p3 = scmp.ne.s32.totalorder %s34_s22, %s604_s8  ;;  %p610_p5 = scmp.lt.s32.totalorder %s604_s8, %s604_s8 }
   0xf   :  { %p611_p6 = por %p610_p5, %p609_p4 }
  0x11   :  { %p612_p7 = pnand %p611_p6, %p605_p3 }
  0x13   :  { %615 = shalt.err (!%p612_p7)
}
  0x14   :  { %s760_s9 = smov 128   ;;  %s761_s10 = smov 8  }
  0x15   :  { %39 = dma.hbm_to_vmem [thread:$0]  %s932_s1, 512, %s34_s22, [#allocation6], %s760_s9, %s760_s9, %s761_s10  }
  0x16   :  { %s616_s15 = scalar_lea.hbm %s934_s3, 1024 }
  0x17   :  { %p617_p8 = scmp.ne.s32.totalorder %s934_s3, %s616_s15  ;;  %p620_p9 = scmp.lt.u32.totalorder %s616_s15, %s934_s3 }
  0x19   :  { %p622_p10 = pnand %p620_p9, %p617_p8 }
  0x1b   :  { %625 = shalt.err (!%p622_p10)
}
  0x1c   :  { %s626_s20 = scalar_lea.vmem %s807_s24, 1024  ;;  %p631_p12 = scmp.lt.s32.totalorder %s807_s24, %s807_s24 }
  0x1d   :  { %p627_p11 = scmp.ne.s32.totalorder %s807_s24, %s626_s20  ;;  %p632_p13 = scmp.lt.s32.totalorder %s626_s20, %s626_s20 }
  0x1f   :  { %p633_p0 = por %p632_p13, %p631_p12 }
  0x21   :  { %p634_p1 = pnand %p633_p0, %p627_p11 }
  0x23   :  { %637 = shalt.err (!%p634_p1)
}
  0x24   :  { %s762_s1 = smov 64   ;;  %s763_s21 = smov 4  }
  0x25   :  { %61 = dma.hbm_to_vmem [thread:$0]  %s934_s3, 1024, %s807_s24, [#allocation9], %s762_s1, %s762_s1, %s763_s21  }
  0x26   :  { %s764_s25 = smov [#allocation2]   ;;  %s765_s27 = smov [#allocation7]  }
  0x27   :  { %s21_s26 = sshll.u32 %s764_s25, 4  ;;  %s46_s28 = sshll.u32 %s765_s27, 4  ;;  %s22_s26 = int_to_ptr.vmem [resolvable:$true] %s21_s26  ;;  %s47_s28 = int_to_ptr.vmem [resolvable:$true] %s46_s28 }
  0x28   :  { %s638_s7 = scalar_lea.hbm %s931_s0, 256 }
  0x29   :  { %p639_p2 = scmp.ne.s32.totalorder %s931_s0, %s638_s7  ;;  %p642_p3 = scmp.lt.u32.totalorder %s638_s7, %s931_s0 }
  0x2b   :  { %p644_p4 = pnand %p642_p3, %p639_p2 }
  0x2d   :  { %647 = shalt.err (!%p644_p4)
}
  0x2e   :  { %s648_s3 = scalar_lea.vmem %s22_s26, 256  ;;  %p653_p6 = scmp.lt.s32.totalorder %s22_s26, %s22_s26 }
  0x2f   :  { %p649_p5 = scmp.ne.s32.totalorder %s22_s26, %s648_s3  ;;  %p654_p7 = scmp.lt.s32.totalorder %s648_s3, %s648_s3 }
  0x31   :  { %p655_p8 = por %p654_p7, %p653_p6 }
  0x33   :  { %p656_p9 = pnand %p655_p8, %p649_p5 }
  0x35   :  { %659 = shalt.err (!%p656_p9)
}
  0x36   :  { %27 = dma.hbm_to_vmem [thread:$0]  %s931_s0, 256, %s22_s26, [#allocation3], %s760_s9, %s760_s9, %s761_s10  }
  0x37   :  { %s660_s17 = scalar_lea.hbm %s933_s2, 32 }
  0x38   :  { %p661_p10 = scmp.ne.s32.totalorder %s933_s2, %s660_s17  ;;  %p664_p11 = scmp.lt.u32.totalorder %s660_s17, %s933_s2 }
  0x3a   :  { %p666_p12 = pnand %p664_p11, %p661_p10 }
  0x3c   :  { %669 = shalt.err (!%p666_p12)
}
  0x3d   :  { %s670_s23 = scalar_lea.vmem %s47_s28, 32  ;;  %p675_p0 = scmp.lt.s32.totalorder %s47_s28, %s47_s28 }
  0x3e   :  { %p671_p13 = scmp.ne.s32.totalorder %s47_s28, %s670_s23  ;;  %p676_p1 = scmp.lt.s32.totalorder %s670_s23, %s670_s23 }
  0x40   :  { %p677_p2 = por %p676_p1, %p675_p0 }
  0x42   :  { %p678_p3 = pnand %p677_p2, %p671_p13 }
  0x44   :  { %681 = shalt.err (!%p678_p3)
}
  0x45   :  { %49 = dma.hbm_to_vmem [thread:$0]  %s933_s2, 32, %s47_s28, [#allocation6]  }
  0x46   :  { %s766_s10 = smov [#allocation10]   ;;  %s767_s26 = smov [#allocation11]  }
  0x47   :  { %s67_s25 = sshll.u32 %s766_s10, 4  ;;  %s80_s27 = sshll.u32 %s767_s26, 4  ;;  %s68_s25 = int_to_ptr.vmem [resolvable:$true] %s67_s25  ;;  %s81_s27 = int_to_ptr.vmem [resolvable:$true] %s80_s27 }
  0x48   :  { %s682_s7 = scalar_lea.hbm %s935_s4, 1024 }
  0x49   :  { %p683_p4 = scmp.ne.s32.totalorder %s935_s4, %s682_s7  ;;  %p686_p5 = scmp.lt.u32.totalorder %s682_s7, %s935_s4 }
  0x4b   :  { %p688_p6 = pnand %p686_p5, %p683_p4 }
  0x4d   :  { %691 = shalt.err (!%p688_p6)
}
  0x4e   :  { %s692_s2 = scalar_lea.vmem %s68_s25, 1024  ;;  %p697_p8 = scmp.lt.s32.totalorder %s68_s25, %s68_s25 }
  0x4f   :  { %p693_p7 = scmp.ne.s32.totalorder %s68_s25, %s692_s2  ;;  %p698_p9 = scmp.lt.s32.totalorder %s692_s2, %s692_s2 }
  0x51   :  { %p699_p10 = por %p698_p9, %p697_p8 }
  0x53   :  { %p700_p11 = pnand %p699_p10, %p693_p7 }
  0x55   :  { %703 = shalt.err (!%p700_p11)
}
  0x56   :  { %73 = dma.hbm_to_vmem [thread:$0]  %s935_s4, 1024, %s68_s25, [#allocation9], %s762_s1, %s762_s1, %s763_s21  }
  0x57   :  { %s704_s15 = scalar_lea.hbm %s936_s5, 16 }
  0x58   :  { %p705_p12 = scmp.ne.s32.totalorder %s936_s5, %s704_s15  ;;  %p708_p13 = scmp.lt.u32.totalorder %s704_s15, %s936_s5 }
  0x5a   :  { %p710_p0 = pnand %p708_p13, %p705_p12 }
  0x5c   :  { %713 = shalt.err (!%p710_p0)
}
  0x5d   :  { %s714_s20 = scalar_lea.vmem %s81_s27, 16  ;;  %s718_s22 = scalar_lea.vmem %s81_s27, 32 }
  0x5e   :  { %p715_p1 = scmp.ne.s32.totalorder %s81_s27, %s714_s20  ;;  %p719_p2 = scmp.lt.s32.totalorder %s81_s27, %s81_s27 }
  0x5f   :  { %p720_p3 = scmp.lt.s32.totalorder %s718_s22, %s714_s20 }
  0x61   :  { %p721_p4 = por %p720_p3, %p719_p2 }
  0x63   :  { %p722_p5 = pnand %p721_p4, %p715_p1 }
  0x65   :  { %725 = shalt.err (!%p722_p5)
}
  0x66   :  { %83 = dma.hbm_to_vmem [thread:$0]  %s936_s5, 16, %s81_s27, [#allocation12]  }
  0x67   :  { %748 = dma.done.wait [#allocation3], 256  }
  0x68   :  { %749 = vsyncadd [#allocation3], 4294967040 }
  0x69   :  { %750 = dma.done.wait [#allocation6], 544  }
  0x6a   :  { %751 = vsyncadd [#allocation6], 4294966752 }
  0x6b   :  { %752 = dma.done.wait [#allocation9], 2048  }
  0x6c   :  { %753 = vsyncadd [#allocation9], 4294965248 }
  0x6d   :  { %754 = dma.done.wait [#allocation12], 16  }
  0x6e   :  { %755 = vsyncadd [#allocation12], 4294967280  ;;  %v768_v0 = vmov 0   ;;  %v769_v1 = vmov 0.0   ;;  %v564_v2 = vld [vmem:[#allocation5 + $0x4] ss:$8 sps:$4 sm:$0xff]   ;;  %v112_v17 = vlaneseq }
  0x6f   :  { %178 = vmatprep.mubr.bf16.mxu0 %v768_v0  ;;  %510 = vmatprep.subr.bf16.mxu1 %v769_v1  ;;  %v566_v3 = vld [vmem:[#allocation5] ss:$8 sps:$4 sm:$0xff]   ;;  %v567_v4 = vld [vmem:[#allocation5 + $0x14] ss:$8 sps:$4 sm:$0xff]   ;;  %v569_v5 = vld [vmem:[#allocation5 + $0x10] ss:$8 sps:$4 sm:$0xff]  }
  0x70   :  { %146 = vmatprep.subr.bf16.mxu0 %v564_v2  ;;  %v103_v6 = vld [vmem:[#allocation2] sm:$0xff]  ;;  %v104_v7 = vld [vmem:[#allocation2 + $0x8] sm:$0xff]  ;;  %vm142_vm0 = vcmask 261120   ;;  %v570_v9 = vld [vmem:[#allocation8] sm:$0xff]   ;;  %vm770_vm1 = vmmov 0   ;;  %v113_v18 = vshrl.u32 %v112_v17, 7 }
  0x71   :  { %147 = vmatpush1.bf16.msra.mxu0 %v566_v3  ;;  %v105_v8 = vpack.c.bf16 %v104_v7, %v103_v6  ;;  %v571_v10 = vld [vmem:[#allocation8 + $0x8] sm:$0xff]   ;;  %v572_v11 = vld [vmem:[#allocation8 + $0x10] sm:$0xff]   ;;  %v573_v12 = vld [vmem:[#allocation8 + $0x18] sm:$0xff]   ;;  %526 = vmatprep.mubr.msk.bf16.mxu1 %vm770_vm1, %v769_v1  ;;  %s771_s5 = smov [#allocation13]  }
  0x72   :  { %148 = vmatprep.subr.bf16.mxu0 %v567_v4  ;;  %v574_v13 = vld [vmem:[#allocation8 + $0x20] sm:$0xff]   ;;  %v575_v14 = vld [vmem:[#allocation8 + $0x28] sm:$0xff]   ;;  %v576_v15 = vld [vmem:[#allocation8 + $0x30] sm:$0xff]   ;;  %v114_v19 = vsub.s32 0, %v113_v18  ;;  %v118_v21 = vsub.s32 1, %v113_v18  ;;  %s446_s0 = sshll.u32 %s771_s5, 4  ;;  %s447_s0 = int_to_ptr.vmem [resolvable:$true] %s446_s0 }
  0x73   :  { %v577_v16 = vld [vmem:[#allocation8 + $0x38] sm:$0xff]   ;;  %v578_v35 = vld [vmem:[#allocation10] sm:$0xff]   ;;  %v579_v36 = vld [vmem:[#allocation10 + $0x8] sm:$0xff]   ;;  %s726_s9 = scalar_lea.vmem %s447_s0, 128  ;;  %p731_p7 = scmp.lt.s32.totalorder %s447_s0, %s447_s0 }
  0x74   :  { %v110_v20 = vld [vmem:[#allocation7] sm:$0x3]  ;;  %511 = vmatpush3.bf16.msra.mxu1 %v578_v35  ;;  %v580_v37 = vld [vmem:[#allocation10 + $0x10] sm:$0xff]   ;;  %v582_v47 = vld [vmem:[#allocation10 + $0x20] sm:$0xff]   ;;  %p727_p6 = scmp.ne.s32.totalorder %s447_s0, %s726_s9  ;;  %p732_p8 = scmp.lt.s32.totalorder %s726_s9, %s726_s9 }
  0x75   :  { %149 = vmatpush1.bf16.msra.mxu0 %v569_v5  ;;  %v115_v22 = vrot.slane %v110_v20, %v114_v19  ;;  %v119_v23 = vrot.slane %v110_v20, %v118_v21  ;;  %512 = vmatprep.subr.bf16.mxu1 %v769_v1  ;;  %v581_v46 = vld [vmem:[#allocation10 + $0x18] sm:$0xff]   ;;  %v583_v48 = vld [vmem:[#allocation10 + $0x28] sm:$0xff]   ;;  %v584_v49 = vld [vmem:[#allocation10 + $0x30] sm:$0xff]  }
  0x76   :  { %530 = vmatprep.subr.bf16.mxu0 %v769_v1  ;;  %v585_v50 = vld [vmem:[#allocation10 + $0x38] sm:$0xff]   ;;  %p733_p9 = por %p732_p8, %p731_p7 }
  0x78   :  { %465 = vmatmul.mubr.msk.bf16.vlgmr.msra.gmra.mrb[0].mxu0 %vm142_vm0, %v105_v8  ;;  %513 = vmatpush3.bf16.msra.mxu1 %v579_v36  ;;  %p734_p10 = pnand %p733_p9, %p727_p6 }
  0x79   :  { %531 = vmatpush3.bf16.msra.mxu0 %v570_v9  ;;  %546 = vmatprep.mubr.msk.bf16.mxu0 %vm770_vm1, %v769_v1 }
  0x7a   :  { %532 = vmatprep.subr.bf16.mxu0 %v769_v1  ;;  %514 = vmatprep.subr.bf16.mxu1 %v769_v1 }
  0x7c   :  { %515 = vmatpush3.bf16.msra.mxu1 %v580_v37 }
  0x7d   :  { %533 = vmatpush3.bf16.msra.mxu0 %v571_v10  ;;  %516 = vmatprep.subr.bf16.mxu1 %v769_v1 }
  0x7e   :  { %534 = vmatprep.subr.bf16.mxu0 %v769_v1 }
  0x80   :  { %517 = vmatpush3.bf16.msra.mxu1 %v581_v46 }
  0x81   :  { %535 = vmatpush3.bf16.msra.mxu0 %v572_v11  ;;  %518 = vmatprep.subr.bf16.mxu1 %v769_v1 }
  0x82   :  { %536 = vmatprep.subr.bf16.mxu0 %v769_v1 }
  0x84   :  { %519 = vmatpush3.bf16.msra.mxu1 %v582_v47 }
  0x85   :  { %537 = vmatpush3.bf16.msra.mxu0 %v573_v12  ;;  %520 = vmatprep.subr.bf16.mxu1 %v769_v1 }
  0x86   :  { %538 = vmatprep.subr.bf16.mxu0 %v769_v1 }
  0x88   :  { %521 = vmatpush3.bf16.msra.mxu1 %v583_v48 }
  0x89   :  { %539 = vmatpush3.bf16.msra.mxu0 %v574_v13  ;;  %522 = vmatprep.subr.bf16.mxu1 %v769_v1 }
  0x8a   :  { %540 = vmatprep.subr.bf16.mxu0 %v769_v1 }
  0x8c   :  { %523 = vmatpush3.bf16.msra.mxu1 %v584_v49 }
  0x8d   :  { %541 = vmatpush3.bf16.msra.mxu0 %v575_v14  ;;  %524 = vmatprep.subr.bf16.mxu1 %v769_v1 }
  0x8e   :  { %542 = vmatprep.subr.bf16.mxu0 %v769_v1 }
  0x90   :  { %525 = vmatpush3.bf16.msra.mxu1 %v585_v50 }
  0x91   :  { %543 = vmatpush3.bf16.msra.mxu0 %v576_v15 }
  0x92   :  { %544 = vmatprep.subr.bf16.mxu0 %v769_v1  ;;  %v482_v1 = vld [vmem:[#allocation11] ss:$0 sm:$0xff] }
  0x95   :  { %545 = vmatpush3.bf16.msra.mxu0 %v577_v16 }
 0x14b   :  { %v180_v24 = vpop.f32.mrb[0].mxu0 }
 0x14c   :  { %v181_v25 = vadd.f32 %v180_v24, %v115_v22  ;;  %v182_v26 = vpop.f32.mrb[1].mxu0 }
 0x14d   :  { %v183_v27 = vadd.f32 %v182_v26, %v119_v23  ;;  %v184_v28 = vpop.f32.mrb[2].mxu0 }
 0x14e   :  { %v186_v29 = vpop.f32.mrb[3].mxu0  ;;  %189 = vmax.xlane.f32.xlu0 %v181_v25  ;;  %v185_v31 = vadd.f32 %v184_v28, %v115_v22 }
 0x14f   :  { %v187_v30 = vadd.f32 %v186_v29, %v119_v23  ;;  %v205_v32 = vmax.f32 %v183_v27, 0.0 }
 0x151   :  { %v206_v33 = vmax.f32 %v187_v30, 0.0 }
 0x152   :  { %191 = vmax.xlane.f32.xlu0 %v185_v31 }
 0x153   :  { %v207_v34 = vpack.c.bf16 %v206_v33, %v205_v32 }
 0x155   :  { %547 = vmatmul.mubr.bf16.vlgmr.msra.gmra.mrb[4].mxu0 %v207_v34 }
 0x1db   :  { %v190_v38 = vpop.xlane.xlu0 %189 }
 0x1dc   :  { %v193_v39 = vsub.f32 %v181_v25, %v190_v38 }
 0x1de   :  { %v195_v40 = vmul.f32 1.442695, %v193_v39 }
 0x1df   :  { %v192_v41 = vpop.xlane.xlu0 %191 }
 0x1e0   :  { %586 = vpow2.f32 %v195_v40  ;;  %v194_v42 = vsub.f32 %v185_v31, %v192_v41 }
 0x1e2   :  { %v197_v43 = vmul.f32 1.442695, %v194_v42 }
 0x1e4   :  { %588 = vpow2.f32 %v197_v43 }
 0x1ea   :  { %v587_v44 = vpop.eup %586 }
 0x1eb   :  { %199 = vadd.xlane.f32.xlu1 %v587_v44 }
 0x1ee   :  { %v589_v45 = vpop.eup %588 }
 0x1ef   :  { %201 = vadd.xlane.f32.xlu1 %v589_v45 }
 0x228   :  { %v415_v51 = vpop.f32.mrb[4].mxu0 }
 0x229   :  { %v548_v52 = vpop.f32.mrb[5].mxu0 }
 0x22a   :  { %v418_v53 = vpop.f32.mrb[6].mxu0 }
 0x22b   :  { %v549_v54 = vpop.f32.mrb[7].mxu0 }
 0x278   :  { %v200_v55 = vpop.xlane.xlu1 %199 }
 0x279   :  { %590 = vrcp.f32 %v200_v55 }
 0x27c   :  { %v202_v56 = vpop.xlane.xlu1 %201 }
 0x27d   :  { %592 = vrcp.f32 %v202_v56 }
 0x283   :  { %v591_v57 = vpop.eup %590 }
 0x284   :  { %v208_v59 = vmul.f32 %v591_v57, %v587_v44 }
 0x287   :  { %v593_v58 = vpop.eup %592 }
 0x288   :  { %v209_v60 = vmul.f32 %v593_v58, %v589_v45 }
 0x28a   :  { %v210_v61 = vpack.c.bf16 %v209_v60, %v208_v59 }
 0x28c   :  { %v211_v62 = vmul.bf16 %v210_v61, %v207_v34 }
 0x28e   :  { %527 = vmatmul.mubr.bf16.vlgmr.msra.gmra.mrb[0].mxu1 %v211_v62 }
 0x361   :  { %v326_v63 = vpop.f32.mrb[0].mxu1 }
 0x362   :  { %v416_v0 = vadd.f32 %v415_v51, %v326_v63  ;;  %v528_v2 = vpop.f32.mrb[1].mxu1 }
 0x363   :  { %v329_v3 = vpop.f32.mrb[2].mxu1 }
 0x364   :  { %v419_v4 = vadd.f32 %v418_v53, %v329_v3  ;;  %v529_v5 = vpop.f32.mrb[3].mxu1  ;;  %v429_v6 = vadd.f32 %v482_v1, %v416_v0 }
 0x366   :  { %v430_v7 = vadd.f32 %v482_v1, %v419_v4 }
 0x368   :  { %v490_v8 = vpack.c.bf16 %v430_v7, %v429_v6 }
 0x36a   :  { %491 = vst [vmem:[#allocation13] sm:$0xff] %v490_v8  }
 0x36b   :  { %737 = shalt.err (!%p734_p10)
}
 0x36c   :  { %s738_s26 = scalar_lea.hbm %s937_s6, 128 }
 0x36d   :  { %p739_p11 = scmp.ne.s32.totalorder %s937_s6, %s738_s26  ;;  %p742_p12 = scmp.lt.u32.totalorder %s738_s26, %s937_s6 }
 0x36f   :  { %p744_p13 = pnand %p742_p12, %p739_p11 }
 0x371   :  { %747 = shalt.err (!%p744_p13)
}
 0x372   :  { %452 = dma.vmem_to_hbm [thread:$0]  %s447_s0, 128, %s937_s6, [#allocation4], %s762_s1, %s762_s1, %s763_s21  }
 0x373   :  { %756 = dma.done.wait [#allocation4], 128  }
 0x374   :  { %757 = vsyncadd [#allocation4], 4294967168 }
 0x375   :  { %456 = vsyncpa [#allocation3], 1 }
 0x376   :  { %457 = vsyncpa [#allocation6], 1 }
 0x377   :  { %458 = vsyncpa [#allocation9], 1 }
 0x378   :  { %459 = vsyncpa [#allocation12], 1 }
 0x379   :  { %460 = vsyncpa [#allocation4], 1 }

</bundles_post_ra>
